<compile_context>
chip_gen: v5e
topology: v5e:2x2
jax: 0.10.0
libtpu: 0.0.40
codegen_flags: <defaults>
</compile_context>

<pallas_src>
import numpy as np
import jax
import jax.numpy as jnp
from jax.experimental import pallas as pl
from jax.experimental.pallas import tpu as pltpu


def _round_up(n, m):
    return ((n + m - 1) // m) * m


# ---------------------------------------------------------------------------
# Pallas kernel: three fused MXU passes over pre-packed weights, per batch tile
# ---------------------------------------------------------------------------
def _ensemble_kernel(x_ref, wt_ref, bt_ref, w1_ref, b1_ref, w2_ref, b2_ref,
                     out_ref):
    """Per-batch-tile fused forward:

      t = relu(x @ [Wbase | Wprior]             + [bbase  | bprior ])  # (TB, 2H)
      h = relu(t @ blockdiag(W1_post, W1_prior) + [b1_post| b1_prior]) # (TB, 2KE)
      y =      h @ W2(scales folded)            + b2_combined          # (TB, K)

    MXU operands use the packed-weight dtype (bf16 by default); accumulation,
    bias adds and ReLUs are f32 on the VPU.
    """
    mxu_dtype = wt_ref.dtype
    x = x_ref[...].astype(mxu_dtype)   # no-op if the caller already feeds bf16

    # Fused trunk: [logits | prior_logits]  (one lane-full MXU pass, N = 2H)
    t = jnp.dot(x, wt_ref[...], preferred_element_type=jnp.float32) + bt_ref[...]
    t = jnp.maximum(t, 0.0)

    # Fused head layer 1 (posterior + prior, block-diagonal weight; N = 2*K*E)
    h = (jnp.dot(t.astype(mxu_dtype), w1_ref[...],
                 preferred_element_type=jnp.float32) + b1_ref[...])
    h = jnp.maximum(h, 0.0)

    # Fused head layer 2: every E->1 head output (posterior & prior) with the
    # posterior/prior scales folded into w2 host-side.  N = noise_dim is tiny;
    # the idle MXU columns are hidden behind the (memory-bound) x-tile DMA.
    out_ref[...] = (jnp.dot(h.astype(mxu_dtype), w2_ref[...],
                            preferred_element_type=jnp.float32) + b2_ref[...])


# ---------------------------------------------------------------------------
# Host-side parameter packing (done once, outside the hot path)
# ---------------------------------------------------------------------------
def pack_params(raw_params, prior_scale=1.0, posterior_scale=1.0,
                mxu_dtype=jnp.bfloat16):
    """Packs the 12 module parameters into 6 fused kernel operands.

    Matmul weights are cast to `mxu_dtype` here (hoisted out of the per-call
    path); biases stay f32 (bias-add / ReLU run in f32).
    """
    (bw, bb, hw1, hb1, hw2, hb2, pw, pb, pw1, pb1, pw2, pb2) = raw_params
    K, H, E = hw1.shape  # noise_dim, hidden, ensemble hidden

    # --- trunk: [basedmodel | priormodel] -----------------------------------
    wt = jnp.concatenate([bw, pw], axis=1)                       # (in, 2H)
    bt = jnp.concatenate([bb, pb], axis=1)                       # (1, 2H)

    # --- head layer 1: block-diagonal posterior/prior weight ----------------
    w1_post = jnp.transpose(hw1, (1, 0, 2)).reshape(H, K * E)    # (H, K*E)
    w1_prior = jnp.transpose(pw1, (1, 0, 2)).reshape(H, K * E)   # (H, K*E)
    zeros = jnp.zeros((H, K * E), jnp.float32)
    w1 = jnp.concatenate(
        [jnp.concatenate([w1_post, zeros], axis=1),
         jnp.concatenate([zeros, w1_prior], axis=1)], axis=0)    # (2H, 2*K*E)
    b1 = jnp.concatenate(
        [hb1.reshape(1, K * E), pb1.reshape(1, K * E)], axis=1)  # (1, 2*K*E)

    # --- head layer 2: all E->1 heads + scale combination in one matrix -----
    eye = jnp.eye(K, dtype=jnp.float32)
    post2 = posterior_scale * hw2[:, :, 0]                       # (K, E)
    prior2 = prior_scale * pw2[:, :, 0]                          # (K, E)
    w2_post = (post2[:, :, None] * eye[:, None, :]).reshape(K * E, K)
    w2_prior = (prior2[:, :, None] * eye[:, None, :]).reshape(K * E, K)
    w2 = jnp.concatenate([w2_post, w2_prior], axis=0)            # (2*K*E, K)

    b2 = (posterior_scale * hb2[:, 0, 0]
          + prior_scale * pb2[:, 0, 0]).reshape(1, K)            # (1, K)

    return (wt.astype(mxu_dtype), bt.astype(jnp.float32),
            w1.astype(mxu_dtype), b1.astype(jnp.float32),
            w2.astype(mxu_dtype), b2.astype(jnp.float32))


# ---------------------------------------------------------------------------
# Forward wrapper (mirrors EnsembleNet.forward(z, x))
# ---------------------------------------------------------------------------
def ensemble_forward(z, x, packed_params, *, block_b=1024):
    """Returns (B, noise_dim) for multi-head z, or (B,) for one-hot single z.

    block_b: batch tile size.  When smaller than the (padded) batch it must be
    a multiple of 128; the 1024 default sits near the HBM roofline while
    keeping per-step VMEM usage at a few MiB on every TPU generation
    (including v7x's 64 MiB physical / 32 MiB scoped budget).
    """
    wt, bt, w1, b1, w2, b2 = packed_params
    B, fin = x.shape
    two_h = wt.shape[1]
    two_ke = w1.shape[1]
    K = w2.shape[1]

    # Batch tiling: one full-array tile for small batches, otherwise block_b
    # tiles (multiple of 128 -> satisfies f32/bf16 sublane packing) with
    # zero-padding of the ragged tail.
    if B <= block_b:
        tb = _round_up(B, 8)
        b_pad = tb
    else:
        assert block_b % 128 == 0, "block_b must be a multiple of 128"
        tb = block_b
        b_pad = _round_up(B, tb)
    if b_pad != B:
        x = jnp.pad(x, ((0, b_pad - B), (0, 0)))
    grid = (b_pad // tb,)

    weight_bytes = sum(int(np.prod(a.shape)) * a.dtype.itemsize
                       for a in (wt, bt, w1, b1, w2, b2))
    cost = pl.CostEstimate(
        flops=int(2 * b_pad * (fin * two_h + two_h * two_ke + two_ke * K)),
        transcendentals=0,
        bytes_accessed=int(b_pad * fin * x.dtype.itemsize
                           + b_pad * K * 4 + weight_bytes))

    out_full = pl.pallas_call(
        _ensemble_kernel,
        out_shape=jax.ShapeDtypeStruct((b_pad, K), jnp.float32),
        grid=grid,
        in_specs=[
            pl.BlockSpec((tb, fin), lambda i: (i, 0)),       # x: tiled over batch
            pl.BlockSpec((fin, two_h), lambda i: (0, 0)),    # weights/biases:
            pl.BlockSpec((1, two_h), lambda i: (0, 0)),      #   VMEM-resident
            pl.BlockSpec((two_h, two_ke), lambda i: (0, 0)),
            pl.BlockSpec((1, two_ke), lambda i: (0, 0)),
            pl.BlockSpec((two_ke, K), lambda i: (0, 0)),
            pl.BlockSpec((1, K), lambda i: (0, 0)),
        ],
        out_specs=pl.BlockSpec((tb, K), lambda i: (i, 0)),
        compiler_params=pltpu.CompilerParams(
            dimension_semantics=("parallel",),   # shards tiles across TCs on v7x
            vmem_limit_bytes=32 * 1024 * 1024),
        cost_estimate=cost,
    )(x, wt, bt, w1, b1, w2, b2)

    out = out_full[:B]
    if z.shape[0] == 1:
        # One-hot head selection, fully on-device (no np.where / host sync).
        idx = jnp.argmax(z[0])
        return jnp.take(out, idx, axis=1)
    return out


# ---------------------------------------------------------------------------
# Parameter init matching the PyTorch module shapes / reset_parameters()
# ---------------------------------------------------------------------------
def init_params(key, in_features, hidden, ens_hidden, action_num, noise_dim):
    keys = jax.random.split(key, 6)

    def linear_init(k, fan_in, fan_out):
        bound = 1.0 / np.sqrt(fan_in)
        kw, kb = jax.random.split(k)
        w = jax.random.uniform(kw, (fan_in, fan_out), jnp.float32, -bound, bound)
        b = jax.random.uniform(kb, (1, fan_out), jnp.float32, -bound, bound)
        return w, b

    def xavier_normal(k, shape):
        fan_in, fan_out = shape[-2], shape[-1]
        std = np.sqrt(2.0 / (fan_in + fan_out)).astype(np.float32)
        return std * jax.random.normal(k, shape, jnp.float32)

    bw, bb = linear_init(keys[0], in_features, hidden)   # basedmodel
    pw, pb = linear_init(keys[1], in_features, hidden)   # priormodel

    hw1 = xavier_normal(keys[2], (noise_dim, hidden, ens_hidden))
    hb1 = jnp.zeros((noise_dim, 1, ens_hidden), jnp.float32)
    hw2 = xavier_normal(keys[3], (noise_dim, ens_hidden, action_num))
    hb2 = jnp.zeros((noise_dim, 1, action_num), jnp.float32)

    pw1 = xavier_normal(keys[4], (noise_dim, hidden, ens_hidden))
    pb1 = jnp.zeros((noise_dim, 1, ens_hidden), jnp.float32)
    pw2 = xavier_normal(keys[5], (noise_dim, ens_hidden, action_num))
    pb2 = jnp.zeros((noise_dim, 1, action_num), jnp.float32)

    return (bw, bb, hw1, hb1, hw2, hb2, pw, pb, pw1, pb1, pw2, pb2)


# ---------------------------------------------------------------------------
# Pure-JAX reference (for verification)
# ---------------------------------------------------------------------------
def reference_forward(z, x, raw_params, prior_scale=1.0, posterior_scale=1.0):
    (bw, bb, hw1, hb1, hw2, hb2, pw, pb, pw1, pb1, pw2, pb2) = raw_params
    logits = jax.nn.relu(x @ bw + bb)
    p_logits = jax.nn.relu(x @ pw + pb)
    outs = []
    for k in range(hw1.shape[0]):
        h = jax.nn.relu(logits @ hw1[k] + hb1[k])
        o = h @ hw2[k] + hb2[k]
        ph = jax.nn.relu(p_logits @ pw1[k] + pb1[k])
        po = ph @ pw2[k] + pb2[k]
        outs.append(posterior_scale * o + prior_scale * po)
    out = jnp.stack(outs, axis=1)[..., 0]   # (B, noise_dim); action_num == 1
    if z.shape[0] == 1:
        idx = jnp.argmax(z[0])
        return jnp.take(out, idx, axis=1)
    return out


if __name__ == "__main__":
    # Small deterministic config: 2H = 128 and 2*K*E = 128 -> the two big fused
    # matmuls are lane-full MXU passes.
    in_features, hidden, ens_hidden, action_num, noise_dim = 32, 64, 32, 1, 2
    B = 8

    key = jax.random.PRNGKey(0)
    kp, kx, kx2 = jax.random.split(key, 3)
    raw = init_params(kp, in_features, hidden, ens_hidden, action_num, noise_dim)

    packed_bf16 = pack_params(raw)                          # default: bf16 MXU operands
    packed_f32 = pack_params(raw, mxu_dtype=jnp.float32)    # exact-parity path

    x = jax.random.normal(kx, (B, in_features), jnp.float32)
    z_multi = jnp.eye(noise_dim, dtype=jnp.float32)         # shape (2, 2)
    ref_multi = reference_forward(z_multi, x, raw)

    # Branch 1: z.shape[0] != 1 -> all heads, output (B, noise_dim).
    out_multi = jax.block_until_ready(ensemble_forward(z_multi, x, packed_bf16))
    np.testing.assert_allclose(np.asarray(out_multi), np.asarray(ref_multi),
                               rtol=5e-2, atol=5e-2)

    out_multi_f32 = jax.block_until_ready(ensemble_forward(z_multi, x, packed_f32))
    np.testing.assert_allclose(np.asarray(out_multi_f32), np.asarray(ref_multi),
                               rtol=1e-5, atol=1e-5)

    # Branch 2: z.shape[0] == 1 (one-hot) -> single head selected on-device, (B,).
    z_one = jnp.zeros((1, noise_dim), jnp.float32).at[0, 1].set(1.0)
    ref_one = reference_forward(z_one, x, raw)
    out_one = jax.block_until_ready(ensemble_forward(z_one, x, packed_f32))
    np.testing.assert_allclose(np.asarray(out_one), np.asarray(ref_one),
                               rtol=1e-5, atol=1e-5)

    # Multi-tile grid + ragged-tail padding path: B=1000 with block_b=256 ->
    # padded to 1024, grid=(4,), weights resident across steps.
    B_big = 1000
    x_big = jax.random.normal(kx2, (B_big, in_features), jnp.float32)
    ref_big = reference_forward(z_multi, x_big, raw)

    out_big_f32 = jax.block_until_ready(
        ensemble_forward(z_multi, x_big, packed_f32, block_b=256))
    np.testing.assert_allclose(np.asarray(out_big_f32), np.asarray(ref_big),
                               rtol=1e-5, atol=1e-5)

    out_big_bf16 = jax.block_until_ready(
        ensemble_forward(z_multi, x_big, packed_bf16, block_b=256))
    np.testing.assert_allclose(np.asarray(out_big_bf16), np.asarray(ref_big),
                               rtol=1e-1, atol=1e-1)

    print("KERNEL_OK")
</pallas_src>

<mosaic_0001>
module attributes {stable_mosaic.version = 11 : i64} {
  func.func @_ensemble_kernel(%arg0: i32, %arg1: memref<8x32xf32, #tpu.memory_space<vmem>>, %arg2: memref<32x128xbf16, #tpu.memory_space<vmem>>, %arg3: memref<1x128xf32, #tpu.memory_space<vmem>>, %arg4: memref<128x128xbf16, #tpu.memory_space<vmem>>, %arg5: memref<1x128xf32, #tpu.memory_space<vmem>>, %arg6: memref<128x2xbf16, #tpu.memory_space<vmem>>, %arg7: memref<1x2xf32, #tpu.memory_space<vmem>>, %arg8: memref<8x2xf32, #tpu.memory_space<vmem>>) attributes {dimension_semantics = [#tpu.dimension_semantics<parallel>], iteration_bounds = array<i64: 1>, scalar_prefetch = 0 : i64, scratch_operands = 0 : i64, tpu.core_type = #tpu.core_type<tc>, window_params = [{transform_indices = @transform_0, window_bounds = array<i64: 8, 32>}, {pipeline_mode = #tpu.pipeline_mode<synchronous>, transform_indices = @transform_1, window_bounds = array<i64: 32, 128>}, {pipeline_mode = #tpu.pipeline_mode<synchronous>, transform_indices = @transform_2, window_bounds = array<i64: 1, 128>}, {pipeline_mode = #tpu.pipeline_mode<synchronous>, transform_indices = @transform_3, window_bounds = array<i64: 128, 128>}, {pipeline_mode = #tpu.pipeline_mode<synchronous>, transform_indices = @transform_4, window_bounds = array<i64: 1, 128>}, {pipeline_mode = #tpu.pipeline_mode<synchronous>, transform_indices = @transform_5, window_bounds = array<i64: 128, 2>}, {pipeline_mode = #tpu.pipeline_mode<synchronous>, transform_indices = @transform_6, window_bounds = array<i64: 1, 2>}, {transform_indices = @transform_7, window_bounds = array<i64: 8, 2>}]} {
    %c0 = arith.constant 0 : index
    %c0_0 = arith.constant 0 : index
    %0 = vector.load %arg1[%c0, %c0_0] : memref<8x32xf32, #tpu.memory_space<vmem>>, vector<8x32xf32>
    %1 = arith.truncf %0 : vector<8x32xf32> to vector<8x32xbf16>
    %c0_1 = arith.constant 0 : index
    %c0_2 = arith.constant 0 : index
    %2 = vector.load %arg2[%c0_1, %c0_2] : memref<32x128xbf16, #tpu.memory_space<vmem>>, vector<32x128xbf16>
    %cst = arith.constant dense<0.000000e+00> : vector<8x128xf32>
    %3 = tpu.matmul %1, %2, %cst {dimension_numbers = #tpu.dot_dimension_numbers<[1], [0], [0], [1], [0, 0, 1, 1], [], []>} : vector<8x32xbf16>, vector<32x128xbf16>, vector<8x128xf32> -> vector<8x128xf32>
    %c0_3 = arith.constant 0 : index
    %c0_4 = arith.constant 0 : index
    %4 = vector.load %arg3[%c0_3, %c0_4] : memref<1x128xf32, #tpu.memory_space<vmem>>, vector<1x128xf32>
    %5 = vector.broadcast %4 : vector<1x128xf32> to vector<8x128xf32>
    %6 = arith.addf %3, %5 : vector<8x128xf32>
    %cst_5 = arith.constant 0.000000e+00 : f32
    %7 = vector.broadcast %cst_5 : f32 to vector<8x128xf32>
    %8 = arith.maximumf %6, %7 : vector<8x128xf32>
    %9 = arith.truncf %8 : vector<8x128xf32> to vector<8x128xbf16>
    %c0_6 = arith.constant 0 : index
    %c0_7 = arith.constant 0 : index
    %10 = vector.load %arg4[%c0_6, %c0_7] : memref<128x128xbf16, #tpu.memory_space<vmem>>, vector<128x128xbf16>
    %cst_8 = arith.constant dense<0.000000e+00> : vector<8x128xf32>
    %11 = tpu.matmul %9, %10, %cst_8 {dimension_numbers = #tpu.dot_dimension_numbers<[1], [0], [0], [1], [0, 0, 1, 1], [], []>} : vector<8x128xbf16>, vector<128x128xbf16>, vector<8x128xf32> -> vector<8x128xf32>
    %c0_9 = arith.constant 0 : index
    %c0_10 = arith.constant 0 : index
    %12 = vector.load %arg5[%c0_9, %c0_10] : memref<1x128xf32, #tpu.memory_space<vmem>>, vector<1x128xf32>
    %13 = vector.broadcast %12 : vector<1x128xf32> to vector<8x128xf32>
    %14 = arith.addf %11, %13 : vector<8x128xf32>
    %cst_11 = arith.constant 0.000000e+00 : f32
    %15 = vector.broadcast %cst_11 : f32 to vector<8x128xf32>
    %16 = arith.maximumf %14, %15 : vector<8x128xf32>
    %17 = arith.truncf %16 : vector<8x128xf32> to vector<8x128xbf16>
    %c0_12 = arith.constant 0 : index
    %c0_13 = arith.constant 0 : index
    %18 = vector.load %arg6[%c0_12, %c0_13] : memref<128x2xbf16, #tpu.memory_space<vmem>>, vector<128x2xbf16>
    %cst_14 = arith.constant dense<0.000000e+00> : vector<8x2xf32>
    %19 = tpu.matmul %17, %18, %cst_14 {dimension_numbers = #tpu.dot_dimension_numbers<[1], [0], [0], [1], [0, 0, 1, 1], [], []>} : vector<8x128xbf16>, vector<128x2xbf16>, vector<8x2xf32> -> vector<8x2xf32>
    %c0_15 = arith.constant 0 : index
    %c0_16 = arith.constant 0 : index
    %20 = vector.load %arg7[%c0_15, %c0_16] : memref<1x2xf32, #tpu.memory_space<vmem>>, vector<1x2xf32>
    %21 = vector.broadcast %20 : vector<1x2xf32> to vector<8x2xf32>
    %22 = arith.addf %19, %21 : vector<8x2xf32>
    %c0_17 = arith.constant 0 : index
    %c0_18 = arith.constant 0 : index
    %23 = vector.load %arg8[%c0_17, %c0_18] : memref<8x2xf32, #tpu.memory_space<vmem>>, vector<8x2xf32>
    tpu.vector_store %arg8[%c0_17, %c0_18], %22 {strides = array<i32>} : memref<8x2xf32, #tpu.memory_space<vmem>>, vector<8x2xf32>,
    return
  }
  func.func @transform_0(%arg0: i32) -> (i32, i32) {
    %c0_i32 = arith.constant 0 : i32
    %c0_i32_0 = arith.constant 0 : i32
    return %arg0, %c0_i32 : i32, i32
  }
  func.func @transform_1(%arg0: i32) -> (i32, i32) {
    %c0_i32 = arith.constant 0 : i32
    %c0_i32_0 = arith.constant 0 : i32
    %c0_i32_1 = arith.constant 0 : i32
    return %c0_i32, %c0_i32_0 : i32, i32
  }
  func.func @transform_2(%arg0: i32) -> (i32, i32) {
    %c0_i32 = arith.constant 0 : i32
    %c0_i32_0 = arith.constant 0 : i32
    %c0_i32_1 = arith.constant 0 : i32
    return %c0_i32, %c0_i32_0 : i32, i32
  }
  func.func @transform_3(%arg0: i32) -> (i32, i32) {
    %c0_i32 = arith.constant 0 : i32
    %c0_i32_0 = arith.constant 0 : i32
    %c0_i32_1 = arith.constant 0 : i32
    return %c0_i32, %c0_i32_0 : i32, i32
  }
  func.func @transform_4(%arg0: i32) -> (i32, i32) {
    %c0_i32 = arith.constant 0 : i32
    %c0_i32_0 = arith.constant 0 : i32
    %c0_i32_1 = arith.constant 0 : i32
    return %c0_i32, %c0_i32_0 : i32, i32
  }
  func.func @transform_5(%arg0: i32) -> (i32, i32) {
    %c0_i32 = arith.constant 0 : i32
    %c0_i32_0 = arith.constant 0 : i32
    %c0_i32_1 = arith.constant 0 : i32
    return %c0_i32, %c0_i32_0 : i32, i32
  }
  func.func @transform_6(%arg0: i32) -> (i32, i32) {
    %c0_i32 = arith.constant 0 : i32
    %c0_i32_0 = arith.constant 0 : i32
    %c0_i32_1 = arith.constant 0 : i32
    return %c0_i32, %c0_i32_0 : i32, i32
  }
  func.func @transform_7(%arg0: i32) -> (i32, i32) {
    %c0_i32 = arith.constant 0 : i32
    %c0_i32_0 = arith.constant 0 : i32
    return %arg0, %c0_i32 : i32, i32
  }
}

</mosaic_0001>

<bundles_post_ra>
// kernel: tpu_custom_call.1
= control target key start
LH: loop header
LB: loop body
LE: loop exit
PB: predicated region body
PF: predicated region fallthrough
CT: control target
= control target key end

     0   :  { %12 = vsyncpa [#allocation3], 0  ;;  %s530_s0 = inlined_call_operand.hbm [shape: f32[8,32], index: 0, kind: input, shape index: {}]   ;;  %s531_s1 = inlined_call_operand.hbm [shape: bf16[32,128], index: 1, kind: input, shape index: {}]   ;;  %s532_s2 = inlined_call_operand.vmem [shape: f32[1,128], index: 2, kind: input, shape index: {}]   ;;  %s533_s3 = inlined_call_operand.vmem [shape: bf16[128,128], index: 3, kind: input, shape index: {}]   ;;  %s534_s4 = inlined_call_operand.vmem [shape: f32[1,128], index: 4, kind: input, shape index: {}]   ;;  %s535_s5 = inlined_call_operand.vmem [shape: bf16[128,2], index: 5, kind: input, shape index: {}]   ;;  %s536_s6 = inlined_call_operand.vmem [shape: f32[1,2], index: 6, kind: input, shape index: {}]   ;;  %s537_s7 = inlined_call_operand.vmem [shape: f32[8,2], index: 7, kind: output, shape index: {}]  }
   0x1   :  { %s19_s26 = sshll.u32 %s530_s0, 4  ;;  %s20_s26 = int_to_ptr.hbm [resolvable:$true] %s19_s26 }
   0x2   :  { %13 = vsyncpa [#allocation5], 0  ;;  %s420_s27 = smov [#allocation2]   ;;  %s29_s8 = sshll.u32 %s531_s1, 4  ;;  %s30_s8 = int_to_ptr.hbm [resolvable:$true] %s29_s8 }
   0x3   :  { %s21_s28 = sshll.u32 %s420_s27, 4  ;;  %s421_s9 = smov [#allocation4]   ;;  %s22_s28 = int_to_ptr.vmem [resolvable:$true] %s21_s28 }
   0x4   :  { %24 = dma.hbm_to_vmem [thread:$0]  %s20_s26, 128, %s22_s28, [#allocation3]  }
   0x5   :  { %s31_s10 = sshll.u32 %s421_s9, 4  ;;  %s422_s11 = smov 64   ;;  %s32_s10 = int_to_ptr.vmem [resolvable:$true] %s31_s10 }
   0x6   :  { %s423_s12 = smov 4  }
   0x7   :  { %37 = dma.hbm_to_vmem [thread:$0]  %s30_s8, 256, %s32_s10, [#allocation5], %s422_s11, %s422_s11, %s423_s12  }
   0x8   :  { %416 = dma.done.wait [#allocation3], 128  }
   0x9   :  { %417 = vsyncadd [#allocation3], 4294967168 }
   0xa   :  { %418 = dma.done.wait [#allocation5], 256  }
   0xb   :  { %419 = vsyncadd [#allocation5], 4294967040  ;;  %v344_v0 = vld [vmem:[#allocation4 + $0x8] sm:$0xff]  ;;  %v352_v1 = vld [vmem:[%s533_s3 + $0x38] sm:$0xff]  ;;  %vm79_vm0 = vcmask 261120   ;;  %vm262_vm1 = vcmask 15360  }
   0xc   :  { %89 = vmatpush.bf16.msra.mxu0 %v344_v0  ;;  %v343_v2 = vld [vmem:[#allocation4] sm:$0xff]  ;;  %v57_v3 = vld [vmem:[#allocation2] sm:$0xff]  ;;  %166 = vmatpush.bf16.msra.mxu1 %v352_v1  ;;  %v351_v4 = vld [vmem:[%s533_s3 + $0x30] sm:$0xff] }
   0xd   :  { %v58_v5 = vpack.c.bf16 %v57_v3, %v57_v3  ;;  %v350_v6 = vld [vmem:[%s533_s3 + $0x28] sm:$0xff]  ;;  %v349_v7 = vld [vmem:[%s533_s3 + $0x20] sm:$0xff]  ;;  %v348_v8 = vld [vmem:[%s533_s3 + $0x18] sm:$0xff] }
   0xe   :  { %v347_v9 = vld [vmem:[%s533_s3 + $0x10] sm:$0xff]  ;;  %v346_v10 = vld [vmem:[%s533_s3 + $0x8] sm:$0xff]  ;;  %v345_v11 = vld [vmem:[%s533_s3] sm:$0xff] }
   0xf   :  { %v360_v12 = vld [vmem:[%s535_s5 + $0x38] sm:$0xff]  ;;  %v359_v13 = vld [vmem:[%s535_s5 + $0x30] sm:$0xff]  ;;  %v358_v14 = vld [vmem:[%s535_s5 + $0x28] sm:$0xff] }
  0x10   :  { %90 = vmatpush.bf16.msra.mxu0 %v343_v2  ;;  %167 = vmatpush.bf16.msra.mxu1 %v351_v4  ;;  %v357_v15 = vld [vmem:[%s535_s5 + $0x20] sm:$0xff]  ;;  %v356_v16 = vld [vmem:[%s535_s5 + $0x18] sm:$0xff]  ;;  %v355_v17 = vld [vmem:[%s535_s5 + $0x10] sm:$0xff] }
  0x11   :  { %249 = vmatpush.bf16.msra.mxu2 %v360_v12  ;;  %v365_v18 = vld [vmem:[%s532_s2] ss:$0 sm:$0xff]  ;;  %v354_v24 = vld [vmem:[%s535_s5 + $0x8] sm:$0xff] }
  0x12   :  { %v353_v25 = vld [vmem:[%s535_s5] sm:$0xff] }
  0x13   :  { %278 = vmatmul.msk.bf16.vlgmr.msra.gmra.mxu0 %vm79_vm0, %v58_v5  ;;  %v366_v26 = vld [vmem:[%s534_s4] ss:$0 sm:$0xff] }
  0x14   :  { %168 = vmatpush.bf16.msra.mxu1 %v350_v6  ;;  %v367_v32 = vld [vmem:[%s536_s6] ss:$0 sm:$0xff] }
  0x15   :  { %250 = vmatpush.bf16.msra.mxu2 %v359_v13 }
  0x18   :  { %169 = vmatpush.bf16.msra.mxu1 %v349_v7 }
  0x19   :  { %251 = vmatpush.bf16.msra.mxu2 %v358_v14 }
  0x1c   :  { %170 = vmatpush.bf16.msra.mxu1 %v348_v8 }
  0x1d   :  { %252 = vmatpush.bf16.msra.mxu2 %v357_v15 }
  0x20   :  { %171 = vmatpush.bf16.msra.mxu1 %v347_v9 }
  0x21   :  { %253 = vmatpush.bf16.msra.mxu2 %v356_v16 }
  0x24   :  { %172 = vmatpush.bf16.msra.mxu1 %v346_v10 }
  0x25   :  { %254 = vmatpush.bf16.msra.mxu2 %v355_v17 }
  0x28   :  { %173 = vmatpush.bf16.msra.mxu1 %v345_v11 }
  0x29   :  { %255 = vmatpush.bf16.msra.mxu2 %v354_v24 }
  0x2d   :  { %256 = vmatpush.bf16.msra.mxu2 %v353_v25 }
  0x90   :  { %v92_v19 = vpop.f32.mrf.mxu0 }
  0x91   :  { %v93_v20 = vadd.f32 %v365_v18, %v92_v19 }
  0x93   :  { %v96_v21 = vmax.f32 %v93_v20, 0.0 }
  0x95   :  { %v97_v22 = vpack.c.bf16 %v96_v21, %v96_v21 }
  0x97   :  { %174 = vmatmul.bf16.vlgmr.msra.gmra.mxu1 %v97_v22 }
  0x98   :  { %v94_v23 = vpop.f32.mrf.mxu0 }
 0x114   :  { %v175_v27 = vpop.f32.mrf.mxu1 }
 0x115   :  { %v176_v28 = vadd.f32 %v366_v26, %v175_v27 }
 0x117   :  { %v179_v29 = vmax.f32 %v176_v28, 0.0 }
 0x119   :  { %v180_v30 = vpack.c.bf16 %v179_v29, %v179_v29 }
 0x11b   :  { %257 = vmatmul.bf16.vlgmr.msra.gmra.mxu2 %v180_v30 }
 0x11c   :  { %v177_v31 = vpop.f32.mrf.mxu1 }
 0x19e   :  { %v258_v33 = vpop.f32.mrf.mxu2 }
 0x19f   :  { %v259_v34 = vadd.f32 %v367_v32, %v258_v33 }
 0x1a1   :  { %263 = vst.msk [vmem:[%s537_s7] sm:$0xff] %vm262_vm1, %v259_v34 }
 0x1a6   :  { %v260_v35 = vpop.f32.mrf.mxu2 }
 0x1a7   :  { %268 = vsyncpa [#allocation3], 1 }
 0x1a8   :  { %269 = vsyncpa [#allocation5], 1 }

</bundles_post_ra>
